<compile_context>
chip_gen: v5e
topology: v5e:2x2
jax: 0.10.0
libtpu: 0.0.40
codegen_flags: <defaults>
</compile_context>

<pallas_src>
import jax
import jax.numpy as jnp
from jax.experimental import pallas as pl
from jax.experimental.pallas import tpu as pltpu


def _make_weighted_avg_kernel(n):
    def kernel(w_ref, *refs):
        # w_ref:   (1, n) softmax(weights), full tiny array
        # refs[:n]: n input tiles, each (TM, LANE)
        # refs[n]:  output tile (TM, LANE)
        o_ref = refs[n]
        w = w_ref[...].astype(jnp.float32)                         # (1, n)
        acc = refs[0][...].astype(jnp.float32) * w[0:1, 0:1]
        for j in range(1, n):                                      # n small & static
            acc = acc + refs[j][...].astype(jnp.float32) * w[0:1, j:j + 1]
        o_ref[...] = acc.astype(o_ref.dtype)
    return kernel


def weighted_average(tensors, weights, *, max_block_bytes=1 << 20):
    """tensors: list of n arrays with identical shape.
       weights: raw (pre-softmax) parameter of shape (n,)."""
    n = len(tensors)
    assert n == weights.shape[0], "number of tensors must match n"
    orig_shape = tensors[0].shape
    dtype = tensors[0].dtype
    itemsize = jnp.dtype(dtype).itemsize

    E = 1
    for s in orig_shape:
        E *= int(s)

    # Lane-dense tiling of the flattened element plane.
    LANE = 512 if E >= 512 else 128
    rows = -(-E // LANE)
    rows8 = -(-rows // 8) * 8

    # Per-block budget: double-buffered (n inputs + 1 output) must fit the
    # v5e 16 MiB scoped-VMEM default; also cap at max_block_bytes (~1 MiB).
    budget = min(max_block_bytes, (12 << 20) // (2 * (n + 1)))
    tm = max(8, (budget // (LANE * itemsize)) // 8 * 8)
    tm = min(tm, rows8)
    rows_pad = -(-rows8 // tm) * tm
    e_pad = rows_pad * LANE

    # Softmax over the tiny (n,) weight vector, computed once in the wrapper.
    sm = jax.nn.softmax(weights.astype(jnp.float32), axis=0).reshape(1, n)

    def to_plane(t):
        f = t.reshape(-1)
        if e_pad != E:
            # TODO(synk): tail-only masked block would avoid this pad copy for
            # non-divisible sizes; padding is only hit when E % (tm*LANE) != 0.
            f = jnp.pad(f, (0, e_pad - E))
        return f.reshape(rows_pad, LANE)

    planes = [to_plane(t) for t in tensors]

    tile_spec = pl.BlockSpec((tm, LANE), lambda i: (i, 0))

    out = pl.pallas_call(
        _make_weighted_avg_kernel(n),
        out_shape=jax.ShapeDtypeStruct((rows_pad, LANE), dtype),
        grid_spec=pltpu.PrefetchScalarGridSpec(
            num_scalar_prefetch=0,
            grid=(rows_pad // tm,),
            in_specs=[pl.BlockSpec((1, n), lambda i: (0, 0))]   # weights (full, tiny)
                     + [tile_spec] * n,                          # n input planes
            out_specs=tile_spec,
        ),
        compiler_params=pltpu.CompilerParams(
            dimension_semantics=("parallel",)),
    )(sm, *planes)

    flat = out.reshape(-1)
    if e_pad != E:
        flat = flat[:E]
    return flat.reshape(orig_shape)


if __name__ == "__main__":
    # Module config (matches WeightedAverage.__init__): n tensors, d_model features.
    n = 4
    d_model = 32
    B, L = 2, 8

    # Deterministic parameter init exactly as in the module: ones(n) / n
    weights = jnp.ones((n,), dtype=jnp.float32) / n

    key = jax.random.PRNGKey(0)
    keys = jax.random.split(key, n)
    tensors = [jax.random.normal(k, (B, L, d_model), dtype=jnp.float32) for k in keys]

    out = weighted_average(tensors, weights)
    out = jax.block_until_ready(out)

    # Pure-JAX reference check (small, padded path)
    sm = jax.nn.softmax(weights, axis=0)
    ref = sum(t * sm[i] for i, t in enumerate(tensors))
    assert out.shape == (B, L, d_model)
    assert jnp.allclose(out, ref, atol=1e-5, rtol=1e-5), "mismatch vs reference (test 1)"

    # Check 2: lane-dense no-padding path (size divides the tile exactly)
    keys2 = jax.random.split(jax.random.PRNGKey(1), n)
    tensors2 = [jax.random.normal(k, (4, 32, 128), dtype=jnp.float32) for k in keys2]
    w2 = jax.random.normal(jax.random.PRNGKey(2), (n,), dtype=jnp.float32)
    out2 = jax.block_until_ready(weighted_average(tensors2, w2))
    sm2 = jax.nn.softmax(w2, axis=0)
    ref2 = sum(t * sm2[i] for i, t in enumerate(tensors2))
    assert jnp.allclose(out2, ref2, atol=1e-5, rtol=1e-5), "mismatch vs reference (test 2)"

    # Check 3: multi-step grid (force a smaller block so grid > 1)
    keys3 = jax.random.split(jax.random.PRNGKey(3), n)
    tensors3 = [jax.random.normal(k, (2, 8, 2048), dtype=jnp.float32) for k in keys3]
    out3 = jax.block_until_ready(
        weighted_average(tensors3, weights, max_block_bytes=64 * 1024))
    ref3 = sum(t * sm[i] for i, t in enumerate(tensors3))
    assert jnp.allclose(out3, ref3, atol=1e-5, rtol=1e-5), "mismatch vs reference (test 3)"

    print("KERNEL_OK")
</pallas_src>

<mosaic_0001>
module attributes {stable_mosaic.version = 11 : i64} {
  func.func @kernel(%arg0: i32, %arg1: memref<1x4xf32, #tpu.memory_space<vmem>>, %arg2: memref<8x512xf32, #tpu.memory_space<vmem>>, %arg3: memref<8x512xf32, #tpu.memory_space<vmem>>, %arg4: memref<8x512xf32, #tpu.memory_space<vmem>>, %arg5: memref<8x512xf32, #tpu.memory_space<vmem>>, %arg6: memref<8x512xf32, #tpu.memory_space<vmem>>) attributes {dimension_semantics = [#tpu.dimension_semantics<parallel>], iteration_bounds = array<i64: 1>, scalar_prefetch = 0 : i64, scratch_operands = 0 : i64, tpu.core_type = #tpu.core_type<tc>, window_params = [{pipeline_mode = #tpu.pipeline_mode<synchronous>, transform_indices = @transform_0, window_bounds = array<i64: 1, 4>}, {transform_indices = @transform_1, window_bounds = array<i64: 8, 512>}, {transform_indices = @transform_2, window_bounds = array<i64: 8, 512>}, {transform_indices = @transform_3, window_bounds = array<i64: 8, 512>}, {transform_indices = @transform_4, window_bounds = array<i64: 8, 512>}, {transform_indices = @transform_5, window_bounds = array<i64: 8, 512>}]} {
    %c0 = arith.constant 0 : index
    %c0_0 = arith.constant 0 : index
    %0 = vector.load %arg1[%c0, %c0_0] : memref<1x4xf32, #tpu.memory_space<vmem>>, vector<1x4xf32>
    %c0_1 = arith.constant 0 : index
    %c0_2 = arith.constant 0 : index
    %1 = vector.load %arg2[%c0_1, %c0_2] : memref<8x512xf32, #tpu.memory_space<vmem>>, vector<8x512xf32>
    %2 = vector.extract_strided_slice %0 {offsets = [0, 0], sizes = [1, 1], strides = [1, 1]} : vector<1x4xf32> to vector<1x1xf32>
    %3 = vector.broadcast %2 : vector<1x1xf32> to vector<8x512xf32>
    %4 = arith.mulf %1, %3 : vector<8x512xf32>
    %c0_3 = arith.constant 0 : index
    %c0_4 = arith.constant 0 : index
    %5 = vector.load %arg3[%c0_3, %c0_4] : memref<8x512xf32, #tpu.memory_space<vmem>>, vector<8x512xf32>
    %6 = vector.extract_strided_slice %0 {offsets = [0, 1], sizes = [1, 1], strides = [1, 1]} : vector<1x4xf32> to vector<1x1xf32>
    %7 = vector.broadcast %6 : vector<1x1xf32> to vector<8x512xf32>
    %8 = arith.mulf %5, %7 : vector<8x512xf32>
    %9 = arith.addf %4, %8 : vector<8x512xf32>
    %c0_5 = arith.constant 0 : index
    %c0_6 = arith.constant 0 : index
    %10 = vector.load %arg4[%c0_5, %c0_6] : memref<8x512xf32, #tpu.memory_space<vmem>>, vector<8x512xf32>
    %11 = vector.extract_strided_slice %0 {offsets = [0, 2], sizes = [1, 1], strides = [1, 1]} : vector<1x4xf32> to vector<1x1xf32>
    %12 = vector.broadcast %11 : vector<1x1xf32> to vector<8x512xf32>
    %13 = arith.mulf %10, %12 : vector<8x512xf32>
    %14 = arith.addf %9, %13 : vector<8x512xf32>
    %c0_7 = arith.constant 0 : index
    %c0_8 = arith.constant 0 : index
    %15 = vector.load %arg5[%c0_7, %c0_8] : memref<8x512xf32, #tpu.memory_space<vmem>>, vector<8x512xf32>
    %16 = vector.extract_strided_slice %0 {offsets = [0, 3], sizes = [1, 1], strides = [1, 1]} : vector<1x4xf32> to vector<1x1xf32>
    %17 = vector.broadcast %16 : vector<1x1xf32> to vector<8x512xf32>
    %18 = arith.mulf %15, %17 : vector<8x512xf32>
    %19 = arith.addf %14, %18 : vector<8x512xf32>
    %c0_9 = arith.constant 0 : index
    %c0_10 = arith.constant 0 : index
    %20 = vector.load %arg6[%c0_9, %c0_10] : memref<8x512xf32, #tpu.memory_space<vmem>>, vector<8x512xf32>
    tpu.vector_store %arg6[%c0_9, %c0_10], %19 {strides = array<i32>} : memref<8x512xf32, #tpu.memory_space<vmem>>, vector<8x512xf32>,
    return
  }
  func.func @transform_0(%arg0: i32) -> (i32, i32) {
    %c0_i32 = arith.constant 0 : i32
    %c0_i32_0 = arith.constant 0 : i32
    %c0_i32_1 = arith.constant 0 : i32
    return %c0_i32, %c0_i32_0 : i32, i32
  }
  func.func @transform_1(%arg0: i32) -> (i32, i32) {
    %c0_i32 = arith.constant 0 : i32
    %c0_i32_0 = arith.constant 0 : i32
    return %arg0, %c0_i32 : i32, i32
  }
  func.func @transform_2(%arg0: i32) -> (i32, i32) {
    %c0_i32 = arith.constant 0 : i32
    %c0_i32_0 = arith.constant 0 : i32
    return %arg0, %c0_i32 : i32, i32
  }
  func.func @transform_3(%arg0: i32) -> (i32, i32) {
    %c0_i32 = arith.constant 0 : i32
    %c0_i32_0 = arith.constant 0 : i32
    return %arg0, %c0_i32 : i32, i32
  }
  func.func @transform_4(%arg0: i32) -> (i32, i32) {
    %c0_i32 = arith.constant 0 : i32
    %c0_i32_0 = arith.constant 0 : i32
    return %arg0, %c0_i32 : i32, i32
  }
  func.func @transform_5(%arg0: i32) -> (i32, i32) {
    %c0_i32 = arith.constant 0 : i32
    %c0_i32_0 = arith.constant 0 : i32
    return %arg0, %c0_i32 : i32, i32
  }
}

</mosaic_0001>

<bundles_post_ra>
// kernel: tpu_custom_call.1
= control target key start
LH: loop header
LB: loop body
LE: loop exit
PB: predicated region body
PF: predicated region fallthrough
CT: control target
= control target key end

     0   :  { %10 = vsyncpa [#allocation3], 0  ;;  %s401_s0 = inlined_call_operand.hbm [shape: f32[1,4], index: 0, kind: input, shape index: {}]   ;;  %s402_s1 = inlined_call_operand.hbm [shape: f32[8,512], index: 1, kind: input, shape index: {}]   ;;  %s403_s2 = inlined_call_operand.hbm [shape: f32[8,512], index: 2, kind: input, shape index: {}]   ;;  %s404_s3 = inlined_call_operand.hbm [shape: f32[8,512], index: 3, kind: input, shape index: {}]   ;;  %s405_s4 = inlined_call_operand.hbm [shape: f32[8,512], index: 4, kind: input, shape index: {}]   ;;  %s406_s5 = inlined_call_operand.hbm [shape: f32[8,512], index: 5, kind: output, shape index: {}]  }
   0x1   :  { %11 = vsyncpa [#allocation6], 0 }
   0x2   :  { %12 = vsyncpa [#allocation9], 0  ;;  %s30_s20 = sshll.u32 %s402_s1, 4  ;;  %s31_s20 = int_to_ptr.hbm [resolvable:$true] %s30_s20 }
   0x3   :  { %13 = vsyncpa [#allocation4], 0  ;;  %s343_s21 = smov [#allocation5]   ;;  %s52_s25 = sshll.u32 %s404_s3, 4  ;;  %s53_s25 = int_to_ptr.hbm [resolvable:$true] %s52_s25 }
   0x4   :  { %s32_s22 = sshll.u32 %s343_s21, 4  ;;  %s344_s26 = smov [#allocation8]   ;;  %s33_s22 = int_to_ptr.vmem [resolvable:$true] %s32_s22 }
   0x5   :  { %35 = dma.hbm_to_vmem [thread:$0]  %s31_s20, 512, %s33_s22, [#allocation6]  }
   0x6   :  { %s54_s27 = sshll.u32 %s344_s26, 4  ;;  %s19_s30 = sshll.u32 %s401_s0, 4  ;;  %s55_s27 = int_to_ptr.vmem [resolvable:$true] %s54_s27  ;;  %s20_s30 = int_to_ptr.hbm [resolvable:$true] %s19_s30 }
   0x7   :  { %57 = dma.hbm_to_vmem [thread:$0]  %s53_s25, 512, %s55_s27, [#allocation9]  }
   0x8   :  { %s41_s7 = sshll.u32 %s403_s2, 4  ;;  %s345_s8 = smov [#allocation2]   ;;  %s42_s7 = int_to_ptr.hbm [resolvable:$true] %s41_s7 }
   0x9   :  { %s21_s9 = sshll.u32 %s345_s8, 4  ;;  %s346_s3 = smov [#allocation7]   ;;  %s22_s9 = int_to_ptr.vmem [resolvable:$true] %s21_s9 }
   0xa   :  { %24 = dma.hbm_to_vmem [thread:$0]  %s20_s30, 16, %s22_s9, [#allocation3]  }
   0xb   :  { %s43_s10 = sshll.u32 %s346_s3, 4  ;;  %s63_s13 = sshll.u32 %s405_s4, 4  ;;  %s44_s10 = int_to_ptr.vmem [resolvable:$true] %s43_s10  ;;  %s64_s13 = int_to_ptr.hbm [resolvable:$true] %s63_s13 }
   0xc   :  { %46 = dma.hbm_to_vmem [thread:$0]  %s42_s7, 512, %s44_s10, [#allocation6]  }
   0xd   :  { %s347_s0 = smov [#allocation10]  }
   0xe   :  { %s65_s14 = sshll.u32 %s347_s0, 4  ;;  %s66_s14 = int_to_ptr.vmem [resolvable:$true] %s65_s14 }
   0xf   :  { %68 = dma.hbm_to_vmem [thread:$0]  %s64_s13, 512, %s66_s14, [#allocation9]  }
  0x10   :  { %335 = dma.done.wait [#allocation3], 16  }
  0x11   :  { %336 = vsyncadd [#allocation3], 4294967280 }
  0x12   :  { %337 = dma.done.wait [#allocation6], 1024  }
  0x13   :  { %338 = vsyncadd [#allocation6], 4294966272 }
  0x14   :  { %339 = dma.done.wait [#allocation9], 1024  }
  0x15   :  { %340 = vsyncadd [#allocation9], 4294966272  ;;  %v348_v0 = vmov 0   ;;  %v349_v1 = vmov 2   ;;  %v190_v2 = vld [vmem:[#allocation2] ss:$0 sm:$0xff] }
  0x16   :  { %185 = vset.pattern.permute.xlu0 %v348_v0  ;;  %187 = vset.pattern.permute.xlu1 %v349_v1  ;;  %v350_v3 = vmov 1   ;;  %v351_v4 = vmov 3   ;;  %v90_v7 = vld [vmem:[#allocation5] sm:$0xff]  ;;  %v91_v8 = vld [vmem:[#allocation5 + $0x8] sm:$0xff]  ;;  %v92_v9 = vld [vmem:[#allocation5 + $0x10] sm:$0xff]  ;;  %s352_s2 = smov [#allocation11]  }
  0x17   :  { %97 = vperm.xlu0 %185, %v190_v2   ;;  %125 = vperm.xlu1 %187, %v190_v2   ;;  %v93_v10 = vld [vmem:[#allocation5 + $0x18] sm:$0xff]  ;;  %v120_v11 = vld [vmem:[#allocation8] sm:$0xff]  ;;  %v121_v12 = vld [vmem:[#allocation8 + $0x8] sm:$0xff]  ;;  %s161_s4 = sshll.u32 %s352_s2, 4  ;;  %s163_s17 = sshll.u32 %s406_s5, 4  ;;  %s162_s4 = int_to_ptr.vmem [resolvable:$true] %s161_s4  ;;  %s164_s17 = int_to_ptr.hbm [resolvable:$true] %s163_s17 }
  0x18   :  { %v122_v13 = vld [vmem:[#allocation8 + $0x10] sm:$0xff]  ;;  %v123_v14 = vld [vmem:[#allocation8 + $0x18] sm:$0xff]  ;;  %v104_v15 = vld [vmem:[#allocation7] sm:$0xff] }
  0x19   :  { %v105_v16 = vld [vmem:[#allocation7 + $0x8] sm:$0xff]  ;;  %v106_v17 = vld [vmem:[#allocation7 + $0x10] sm:$0xff]  ;;  %v107_v18 = vld [vmem:[#allocation7 + $0x18] sm:$0xff] }
  0x1a   :  { %v136_v22 = vld [vmem:[#allocation10] sm:$0xff]  ;;  %v137_v23 = vld [vmem:[#allocation10 + $0x8] sm:$0xff]  ;;  %v138_v24 = vld [vmem:[#allocation10 + $0x10] sm:$0xff] }
  0x1b   :  { %v139_v35 = vld [vmem:[#allocation10 + $0x18] sm:$0xff] }
  0x1f   :  { %186 = vset.pattern.permute.xlu0 %v350_v3  ;;  %188 = vset.pattern.permute.xlu1 %v351_v4 }
  0x20   :  { %109 = vperm.xlu0 %186, %v190_v2   ;;  %141 = vperm.xlu1 %188, %v190_v2  }
  0x28   :  { %189 = vset.pattern.permute.xlu0 %v351_v4 }
  0x89   :  { %v98_v5 = vpop.permute.xlu0 %97  ;;  %v126_v6 = vpop.permute.xlu1 %125 }
  0x8a   :  { %v100_v19 = vmul.f32 %v98_v5, %v90_v7  ;;  %v101_v20 = vmul.f32 %v98_v5, %v91_v8  ;;  %v102_v21 = vmul.f32 %v98_v5, %v92_v9  ;;  %v103_v25 = vmul.f32 %v98_v5, %v93_v10 }
  0x8b   :  { %v128_v26 = vmul.f32 %v126_v6, %v120_v11  ;;  %v129_v27 = vmul.f32 %v126_v6, %v121_v12  ;;  %v130_v28 = vmul.f32 %v126_v6, %v122_v13  ;;  %v131_v36 = vmul.f32 %v126_v6, %v123_v14 }
  0x92   :  { %v110_v29 = vpop.permute.xlu0 %109  ;;  %v142_v30 = vpop.permute.xlu1 %141 }
  0x93   :  { %v112_v31 = vmul.f32 %v110_v29, %v104_v15  ;;  %v113_v32 = vmul.f32 %v110_v29, %v105_v16  ;;  %v114_v33 = vmul.f32 %v110_v29, %v106_v17  ;;  %v115_v34 = vmul.f32 %v110_v29, %v107_v18 }
  0x94   :  { %v144_v37 = vmul.f32 %v142_v30, %v136_v22  ;;  %v145_v38 = vmul.f32 %v142_v30, %v137_v23  ;;  %v146_v39 = vmul.f32 %v142_v30, %v138_v24  ;;  %v147_v44 = vmul.f32 %v142_v30, %v139_v35 }
  0x95   :  { %v116_v40 = vadd.f32 %v112_v31, %v100_v19  ;;  %v117_v41 = vadd.f32 %v113_v32, %v101_v20  ;;  %v118_v42 = vadd.f32 %v114_v33, %v102_v21  ;;  %v119_v43 = vadd.f32 %v115_v34, %v103_v25 }
  0x97   :  { %v132_v45 = vadd.f32 %v128_v26, %v116_v40  ;;  %v133_v46 = vadd.f32 %v129_v27, %v117_v41  ;;  %v134_v47 = vadd.f32 %v130_v28, %v118_v42  ;;  %v135_v48 = vadd.f32 %v131_v36, %v119_v43 }
  0x99   :  { %v148_v49 = vadd.f32 %v144_v37, %v132_v45  ;;  %v149_v50 = vadd.f32 %v145_v38, %v133_v46  ;;  %v150_v51 = vadd.f32 %v146_v39, %v134_v47  ;;  %v151_v52 = vadd.f32 %v147_v44, %v135_v48 }
  0x9b   :  { %152 = vst [vmem:[#allocation11] sm:$0xff] %v148_v49 }
  0x9c   :  { %153 = vst [vmem:[#allocation11 + $0x8] sm:$0xff] %v149_v50 }
  0x9d   :  { %154 = vst [vmem:[#allocation11 + $0x10] sm:$0xff] %v150_v51 }
  0x9e   :  { %155 = vst [vmem:[#allocation11 + $0x18] sm:$0xff] %v151_v52 }
  0x9f   :  { %166 = dma.vmem_to_hbm [thread:$0]  %s162_s4, 512, %s164_s17, [#allocation4]  }
  0xa0   :  { %341 = dma.done.wait [#allocation4], 512  }
  0xa1   :  { %342 = vsyncadd [#allocation4], 4294966784 }
  0xa2   :  { %171 = vsyncpa [#allocation3], 1 }
  0xa3   :  { %172 = vsyncpa [#allocation6], 1 }
  0xa4   :  { %173 = vsyncpa [#allocation9], 1 }
  0xa5   :  { %174 = vsyncpa [#allocation4], 1 }

</bundles_post_ra>
